<compile_context>
chip_gen: v5e
topology: v5e:2x2
jax: 0.10.0
libtpu: 0.0.40
codegen_flags: <defaults>
</compile_context>

<pallas_src>
import functools

import jax
import jax.numpy as jnp
from jax.experimental import pallas as pl
from jax.experimental.pallas import tpu as pltpu


def _dice_partials_kernel(logits_ref, tgt_ref, out_ref,
                          inter_acc, psum_acc, tsum_acc,
                          *, ignore_index, hw):
    """Per-image partial sums: out_ref[:, 0]=intersection, [:,1]=sum(probs), [:,2]=sum(onehot)."""
    j = pl.program_id(1)                      # hw-tile index (inner, reduction axis)
    last_j = pl.num_programs(1) - 1

    @pl.when(j == 0)
    def _():
        inter_acc[...] = jnp.zeros_like(inter_acc)
        psum_acc[...] = jnp.zeros_like(psum_acc)
        tsum_acc[...] = jnp.zeros_like(tsum_acc)

    x = logits_ref[...].astype(jnp.float32)   # (C, tile_hw): classes on sublanes
    t = tgt_ref[...]                          # (1, tile_hw) int32
    num_classes, tile_hw = x.shape

    # Lane mask for the (possibly ragged) last tile of the H*W axis.
    col = jax.lax.broadcasted_iota(jnp.int32, (1, tile_hw), 1)
    in_range = (j * tile_hw + col) < hw       # (1, tile_hw) bool

    # Sanitize out-of-range columns before any transcendental (select, so no NaN leak).
    x = jnp.where(in_range, x, 0.0)

    # softmax over the class (sublane) axis  ==  F.softmax(inputs, dim=1)
    m = jnp.max(x, axis=0, keepdims=True)                       # (1, tile_hw)
    e = jnp.exp(x - m)                                          # (C, tile_hw)
    probs = e * pl.reciprocal(jnp.sum(e, axis=0, keepdims=True), approx=True)

    # valid-pixel mask: real pixel AND target != ignore_index
    validf = jnp.logical_and(t != ignore_index, in_range).astype(jnp.float32)  # (1, tile_hw)

    class_ids = jax.lax.broadcasted_iota(jnp.int32, (num_classes, tile_hw), 0)
    one_hot = (t == class_ids).astype(jnp.float32) * validf     # (C, tile_hw)
    probs_valid = probs * validf                                # (C, tile_hw)

    # Lane-wide VPU accumulation only; cross-lane reduce deferred to the epilogue.
    inter_acc[...] += probs_valid * one_hot
    psum_acc[...] += probs_valid
    tsum_acc[...] += one_hot

    @pl.when(j == last_j)
    def _():
        out_ref[:, pl.ds(0, 1)] = jnp.sum(inter_acc[...], axis=1, keepdims=True)
        out_ref[:, pl.ds(1, 1)] = jnp.sum(psum_acc[...], axis=1, keepdims=True)
        out_ref[:, pl.ds(2, 1)] = jnp.sum(tsum_acc[...], axis=1, keepdims=True)


def dice_loss(logits, targets, *, smooth=1e-6, ignore_index=-1, tile_hw=2048):
    """logits: (N, C, H, W) float; targets: (N, H, W) int (ignore_index = -1)."""
    N, C, H, W = logits.shape
    HW = H * W

    # Free reshapes of native NCHW layout: no transpose, no pad HBM copies.
    logits_r = logits.reshape(N, C, HW)
    targets_r = targets.reshape(N, 1, HW).astype(jnp.int32)

    if HW <= tile_hw:
        tile_hw = HW                       # full-extent block is always a legal tile
        num_tiles = 1
    else:
        assert tile_hw % 128 == 0, "tile_hw must be a multiple of 128"
        num_tiles = pl.cdiv(HW, tile_hw)   # ragged last tile is masked in-kernel

    kernel = functools.partial(_dice_partials_kernel,
                               ignore_index=ignore_index, hw=HW)

    # Per-image partial sums (N, C, 3); tiny combine happens in plain JAX below.
    partials = pl.pallas_call(
        kernel,
        out_shape=jax.ShapeDtypeStruct((N, C, 3), jnp.float32),
        grid_spec=pltpu.PrefetchScalarGridSpec(
            num_scalar_prefetch=0,
            grid=(N, num_tiles),
            in_specs=[
                pl.BlockSpec((None, C, tile_hw), lambda n, j: (n, 0, j)),
                pl.BlockSpec((None, 1, tile_hw), lambda n, j: (n, 0, j)),
            ],
            out_specs=pl.BlockSpec((None, C, 3), lambda n, j: (n, 0, 0)),
            scratch_shapes=[
                pltpu.VMEM((C, tile_hw), jnp.float32),   # intersection partials
                pltpu.VMEM((C, tile_hw), jnp.float32),   # probs-sum partials
                pltpu.VMEM((C, tile_hw), jnp.float32),   # one-hot-sum partials
            ],
        ),
        compiler_params=pltpu.CompilerParams(
            # image axis shardable across v7x's 2 TCs; hw-tile axis is the reduction
            dimension_semantics=("parallel", "arbitrary")),
    )(logits_r, targets_r)

    totals = jnp.sum(partials, axis=0)               # (C, 3): combine across images/cores
    inter, psum, tsum = totals[:, 0], totals[:, 1], totals[:, 2]
    dice = (2.0 * inter + smooth) / (psum + tsum + smooth)
    # No valid pixels -> inter == psum == tsum == 0 -> dice == 1 -> loss == 0,
    # matching the PyTorch early-return without data-dependent control flow.
    return 1.0 - jnp.mean(dice)


def _dice_loss_ref(logits, targets, smooth=1e-6, ignore_index=-1):
    """Pure-JAX reference matching the PyTorch module semantics."""
    N, C, H, W = logits.shape
    probs = jax.nn.softmax(logits, axis=1)
    probs_flat = jnp.transpose(probs, (0, 2, 3, 1)).reshape(-1, C)
    t_flat = targets.reshape(-1)
    valid = (t_flat != ignore_index).astype(jnp.float32)[:, None]
    one_hot = jax.nn.one_hot(jnp.clip(t_flat, 0, C - 1), C) * valid
    p_valid = probs_flat * valid
    inter = jnp.sum(p_valid * one_hot, axis=0)
    union = jnp.sum(p_valid, axis=0) + jnp.sum(one_hot, axis=0)
    dice = (2.0 * inter + smooth) / (union + smooth)
    return 1.0 - jnp.mean(dice)


if __name__ == "__main__":
    key = jax.random.PRNGKey(0)
    k_logits, k_tgt, k_ign = jax.random.split(key, 3)

    N, C, H, W = 2, 4, 16, 16
    logits = jax.random.normal(k_logits, (N, C, H, W), dtype=jnp.float32)
    targets = jax.random.randint(k_tgt, (N, H, W), 0, C, dtype=jnp.int32)
    # sprinkle in some ignore_index (-1) pixels
    ignore_mask = jax.random.bernoulli(k_ign, 0.2, (N, H, W))
    targets = jnp.where(ignore_mask, -1, targets)

    loss = dice_loss(logits, targets)
    loss = jax.block_until_ready(loss)

    ref = _dice_loss_ref(logits, targets)
    # Tolerance accounts for the approx (EUP vrcp) softmax reciprocal (~1e-3 rel).
    assert jnp.allclose(loss, ref, atol=2e-3, rtol=2e-3), (loss, ref)

    print("KERNEL_OK")
</pallas_src>

<mosaic_0001>
module attributes {stable_mosaic.version = 11 : i64} {
  func.func @_dice_partials_kernel(%arg0: i32, %arg1: i32, %arg2: memref<1x4x256xf32, #tpu.memory_space<vmem>>, %arg3: memref<1x1x256xi32, #tpu.memory_space<vmem>>, %arg4: memref<1x4x3xf32, #tpu.memory_space<vmem>>, %arg5: memref<4x256xf32, #tpu.memory_space<vmem>>, %arg6: memref<4x256xf32, #tpu.memory_space<vmem>>, %arg7: memref<4x256xf32, #tpu.memory_space<vmem>>) attributes {dimension_semantics = [#tpu.dimension_semantics<parallel>, #tpu.dimension_semantics<arbitrary>], iteration_bounds = array<i64: 2, 1>, scalar_prefetch = 0 : i64, scratch_operands = 3 : i64, tpu.core_type = #tpu.core_type<tc>, window_params = [{transform_indices = @transform_0, window_bounds = array<i64: 1, 4, 256>}, {transform_indices = @transform_1, window_bounds = array<i64: 1, 1, 256>}, {transform_indices = @transform_2, window_bounds = array<i64: 1, 4, 3>}]} {
    %c0_i32 = arith.constant 0 : i32
    %0 = arith.cmpi eq, %arg1, %c0_i32 : i32
    %1 = arith.extui %0 : i1 to i32
    %c0_i32_0 = arith.constant 0 : i32
    %2 = arith.cmpi ne, %1, %c0_i32_0 : i32
    scf.if %2 {
      %cst_23 = arith.constant 0.000000e+00 : f32
      %54 = vector.broadcast %cst_23 : f32 to vector<4x256xf32>
      %c0_24 = arith.constant 0 : index
      %c0_25 = arith.constant 0 : index
      %55 = vector.load %arg5[%c0_24, %c0_25] : memref<4x256xf32, #tpu.memory_space<vmem>>, vector<4x256xf32>
      tpu.vector_store %arg5[%c0_24, %c0_25], %54 {strides = array<i32>} : memref<4x256xf32, #tpu.memory_space<vmem>>, vector<4x256xf32>,
      %cst_26 = arith.constant 0.000000e+00 : f32
      %56 = vector.broadcast %cst_26 : f32 to vector<4x256xf32>
      %c0_27 = arith.constant 0 : index
      %c0_28 = arith.constant 0 : index
      %57 = vector.load %arg6[%c0_27, %c0_28] : memref<4x256xf32, #tpu.memory_space<vmem>>, vector<4x256xf32>
      tpu.vector_store %arg6[%c0_27, %c0_28], %56 {strides = array<i32>} : memref<4x256xf32, #tpu.memory_space<vmem>>, vector<4x256xf32>,
      %cst_29 = arith.constant 0.000000e+00 : f32
      %58 = vector.broadcast %cst_29 : f32 to vector<4x256xf32>
      %c0_30 = arith.constant 0 : index
      %c0_31 = arith.constant 0 : index
      %59 = vector.load %arg7[%c0_30, %c0_31] : memref<4x256xf32, #tpu.memory_space<vmem>>, vector<4x256xf32>
      tpu.vector_store %arg7[%c0_30, %c0_31], %58 {strides = array<i32>} : memref<4x256xf32, #tpu.memory_space<vmem>>, vector<4x256xf32>,
    } else {
    }
    %c0 = arith.constant 0 : index
    %c0_1 = arith.constant 0 : index
    %c0_2 = arith.constant 0 : index
    %3 = vector.load %arg2[%c0, %c0_1, %c0_2] : memref<1x4x256xf32, #tpu.memory_space<vmem>>, vector<1x4x256xf32>
    %4 = vector.shape_cast %3 : vector<1x4x256xf32> to vector<4x256xf32>
    %c0_3 = arith.constant 0 : index
    %c0_4 = arith.constant 0 : index
    %c0_5 = arith.constant 0 : index
    %5 = vector.load %arg3[%c0_3, %c0_4, %c0_5] : memref<1x1x256xi32, #tpu.memory_space<vmem>>, vector<1x1x256xi32>
    %6 = vector.shape_cast %5 : vector<1x1x256xi32> to vector<1x256xi32>
    %7 = tpu.iota {dimensions = array<i32: 1>} : vector<1x256xi32>
    %c256_i32 = arith.constant 256 : i32
    %8 = arith.muli %arg1, %c256_i32 : i32
    %9 = vector.broadcast %8 : i32 to vector<1x256xi32>
    %10 = arith.addi %9, %7 : vector<1x256xi32>
    %c256_i32_6 = arith.constant 256 : i32
    %11 = vector.broadcast %c256_i32_6 : i32 to vector<1x256xi32>
    %12 = arith.cmpi slt, %10, %11 : vector<1x256xi32>
    %cst = arith.constant 0.000000e+00 : f32
    %13 = vector.shape_cast %12 : vector<1x256xi1> to vector<1x256xi1>
    %14 = vector.broadcast %13 : vector<1x256xi1> to vector<4x256xi1>
    %15 = vector.broadcast %cst : f32 to vector<4x256xf32>
    %16 = arith.select %14, %4, %15 : vector<4x256xi1>, vector<4x256xf32>
    %cst_7 = arith.constant dense<0xFF800000> : vector<256xf32>
    %17 = vector.multi_reduction <maximumf>, %16, %cst_7 [0] : vector<4x256xf32> to vector<256xf32>
    %18 = vector.shape_cast %17 : vector<256xf32> to vector<1x256xf32>
    %19 = vector.broadcast %18 : vector<1x256xf32> to vector<4x256xf32>
    %20 = arith.subf %16, %19 : vector<4x256xf32>
    %21 = math.exp %20 : vector<4x256xf32>
    %cst_8 = arith.constant dense<0.000000e+00> : vector<256xf32>
    %22 = vector.multi_reduction <add>, %21, %cst_8 [0] : vector<4x256xf32> to vector<256xf32>
    %23 = vector.shape_cast %22 : vector<256xf32> to vector<1x256xf32>
    %24 = tpu.reciprocal %23 {approx = true} : vector<1x256xf32> -> vector<1x256xf32>
    %25 = vector.broadcast %24 : vector<1x256xf32> to vector<4x256xf32>
    %26 = arith.mulf %21, %25 : vector<4x256xf32>
    %c-1_i32 = arith.constant -1 : i32
    %27 = vector.broadcast %c-1_i32 : i32 to vector<1x256xi32>
    %28 = arith.cmpi ne, %6, %27 : vector<1x256xi32>
    %29 = arith.andi %28, %12 : vector<1x256xi1>
    %30 = arith.extui %29 : vector<1x256xi1> to vector<1x256xi32>
    %31 = arith.sitofp %30 : vector<1x256xi32> to vector<1x256xf32>
    %32 = tpu.iota {dimensions = array<i32: 0>} : vector<4x256xi32>
    %33 = vector.broadcast %6 : vector<1x256xi32> to vector<4x256xi32>
    %34 = arith.cmpi eq, %33, %32 : vector<4x256xi32>
    %35 = arith.extui %34 : vector<4x256xi1> to vector<4x256xi32>
    %36 = arith.sitofp %35 : vector<4x256xi32> to vector<4x256xf32>
    %37 = vector.broadcast %31 : vector<1x256xf32> to vector<4x256xf32>
    %38 = arith.mulf %36, %37 : vector<4x256xf32>
    %39 = vector.broadcast %31 : vector<1x256xf32> to vector<4x256xf32>
    %40 = arith.mulf %26, %39 : vector<4x256xf32>
    %c0_9 = arith.constant 0 : index
    %c0_10 = arith.constant 0 : index
    %41 = vector.load %arg5[%c0_9, %c0_10] : memref<4x256xf32, #tpu.memory_space<vmem>>, vector<4x256xf32>
    %42 = arith.mulf %40, %38 : vector<4x256xf32>
    %43 = arith.addf %41, %42 : vector<4x256xf32>
    %c0_11 = arith.constant 0 : index
    %c0_12 = arith.constant 0 : index
    %44 = vector.load %arg5[%c0_11, %c0_12] : memref<4x256xf32, #tpu.memory_space<vmem>>, vector<4x256xf32>
    tpu.vector_store %arg5[%c0_11, %c0_12], %43 {strides = array<i32>} : memref<4x256xf32, #tpu.memory_space<vmem>>, vector<4x256xf32>,
    %c0_13 = arith.constant 0 : index
    %c0_14 = arith.constant 0 : index
    %45 = vector.load %arg6[%c0_13, %c0_14] : memref<4x256xf32, #tpu.memory_space<vmem>>, vector<4x256xf32>
    %46 = arith.addf %45, %40 : vector<4x256xf32>
    %c0_15 = arith.constant 0 : index
    %c0_16 = arith.constant 0 : index
    %47 = vector.load %arg6[%c0_15, %c0_16] : memref<4x256xf32, #tpu.memory_space<vmem>>, vector<4x256xf32>
    tpu.vector_store %arg6[%c0_15, %c0_16], %46 {strides = array<i32>} : memref<4x256xf32, #tpu.memory_space<vmem>>, vector<4x256xf32>,
    %c0_17 = arith.constant 0 : index
    %c0_18 = arith.constant 0 : index
    %48 = vector.load %arg7[%c0_17, %c0_18] : memref<4x256xf32, #tpu.memory_space<vmem>>, vector<4x256xf32>
    %49 = arith.addf %48, %38 : vector<4x256xf32>
    %c0_19 = arith.constant 0 : index
    %c0_20 = arith.constant 0 : index
    %50 = vector.load %arg7[%c0_19, %c0_20] : memref<4x256xf32, #tpu.memory_space<vmem>>, vector<4x256xf32>
    tpu.vector_store %arg7[%c0_19, %c0_20], %49 {strides = array<i32>} : memref<4x256xf32, #tpu.memory_space<vmem>>, vector<4x256xf32>,
    %c0_i32_21 = arith.constant 0 : i32
    %51 = arith.cmpi eq, %arg1, %c0_i32_21 : i32
    %52 = arith.extui %51 : i1 to i32
    %c0_i32_22 = arith.constant 0 : i32
    %53 = arith.cmpi ne, %52, %c0_i32_22 : i32
    scf.if %53 {
      %c0_23 = arith.constant 0 : index
      %c0_24 = arith.constant 0 : index
      %54 = vector.load %arg5[%c0_23, %c0_24] : memref<4x256xf32, #tpu.memory_space<vmem>>, vector<4x256xf32>
      %cst_25 = arith.constant dense<0.000000e+00> : vector<4xf32>
      %55 = vector.multi_reduction <add>, %54, %cst_25 [1] : vector<4x256xf32> to vector<4xf32>
      %56 = vector.shape_cast %55 : vector<4xf32> to vector<4x1xf32>
      %c0_26 = arith.constant 0 : index
      %c0_27 = arith.constant 0 : index
      %c0_28 = arith.constant 0 : index
      %57 = vector.load %arg4[%c0_26, %c0_27, %c0_28] : memref<1x4x3xf32, #tpu.memory_space<vmem>>, vector<1x4x1xf32>
      %58 = vector.shape_cast %57 : vector<1x4x1xf32> to vector<4x1xf32>
      %59 = vector.shape_cast %56 : vector<4x1xf32> to vector<1x4x1xf32>
      tpu.vector_store %arg4[%c0_26, %c0_27, %c0_28], %59 {strides = array<i32>} : memref<1x4x3xf32, #tpu.memory_space<vmem>>, vector<1x4x1xf32>,
      %c0_29 = arith.constant 0 : index
      %c0_30 = arith.constant 0 : index
      %60 = vector.load %arg6[%c0_29, %c0_30] : memref<4x256xf32, #tpu.memory_space<vmem>>, vector<4x256xf32>
      %cst_31 = arith.constant dense<0.000000e+00> : vector<4xf32>
      %61 = vector.multi_reduction <add>, %60, %cst_31 [1] : vector<4x256xf32> to vector<4xf32>
      %62 = vector.shape_cast %61 : vector<4xf32> to vector<4x1xf32>
      %c0_32 = arith.constant 0 : index
      %c0_33 = arith.constant 0 : index
      %c1 = arith.constant 1 : index
      %63 = vector.load %arg4[%c0_32, %c0_33, %c1] : memref<1x4x3xf32, #tpu.memory_space<vmem>>, vector<1x4x1xf32>
      %64 = vector.shape_cast %63 : vector<1x4x1xf32> to vector<4x1xf32>
      %65 = vector.shape_cast %62 : vector<4x1xf32> to vector<1x4x1xf32>
      tpu.vector_store %arg4[%c0_32, %c0_33, %c1], %65 {strides = array<i32>} : memref<1x4x3xf32, #tpu.memory_space<vmem>>, vector<1x4x1xf32>,
      %c0_34 = arith.constant 0 : index
      %c0_35 = arith.constant 0 : index
      %66 = vector.load %arg7[%c0_34, %c0_35] : memref<4x256xf32, #tpu.memory_space<vmem>>, vector<4x256xf32>
      %cst_36 = arith.constant dense<0.000000e+00> : vector<4xf32>
      %67 = vector.multi_reduction <add>, %66, %cst_36 [1] : vector<4x256xf32> to vector<4xf32>
      %68 = vector.shape_cast %67 : vector<4xf32> to vector<4x1xf32>
      %c0_37 = arith.constant 0 : index
      %c0_38 = arith.constant 0 : index
      %c2 = arith.constant 2 : index
      %69 = vector.load %arg4[%c0_37, %c0_38, %c2] : memref<1x4x3xf32, #tpu.memory_space<vmem>>, vector<1x4x1xf32>
      %70 = vector.shape_cast %69 : vector<1x4x1xf32> to vector<4x1xf32>
      %71 = vector.shape_cast %68 : vector<4x1xf32> to vector<1x4x1xf32>
      tpu.vector_store %arg4[%c0_37, %c0_38, %c2], %71 {strides = array<i32>} : memref<1x4x3xf32, #tpu.memory_space<vmem>>, vector<1x4x1xf32>,
    } else {
    }
    return
  }
  func.func @transform_0(%arg0: i32, %arg1: i32) -> (i32, i32, i32) {
    %c0_i32 = arith.constant 0 : i32
    %c0_i32_0 = arith.constant 0 : i32
    return %arg0, %c0_i32, %arg1 : i32, i32, i32
  }
  func.func @transform_1(%arg0: i32, %arg1: i32) -> (i32, i32, i32) {
    %c0_i32 = arith.constant 0 : i32
    %c0_i32_0 = arith.constant 0 : i32
    return %arg0, %c0_i32, %arg1 : i32, i32, i32
  }
  func.func @transform_2(%arg0: i32, %arg1: i32) -> (i32, i32, i32) {
    %c0_i32 = arith.constant 0 : i32
    %c0_i32_0 = arith.constant 0 : i32
    %c0_i32_1 = arith.constant 0 : i32
    return %arg0, %c0_i32, %c0_i32_0 : i32, i32, i32
  }
}

</mosaic_0001>

<bundles_post_ra>
// kernel: tpu_custom_call.1
= control target key start
LH: loop header
LB: loop body
LE: loop exit
PB: predicated region body
PF: predicated region fallthrough
CT: control target
= control target key end

     0   :  { %7 = vsyncpa [#allocation6], 0  ;;  %s833_s0 = inlined_call_operand.hbm [shape: f32[2,4,256], index: 0, kind: input, shape index: {}]   ;;  %s834_s1 = inlined_call_operand.hbm [shape: s32[2,1,256], index: 1, kind: input, shape index: {}]   ;;  %s835_s2 = inlined_call_operand.vmem [shape: f32[2,4,3], index: 2, kind: output, shape index: {}]  }
   0x1   :  { %9 = vsyncpa [#allocation6 + $0x1], 0 }
   0x2   :  { %10 = vsyncpa [#allocation8], 0 }
   0x3   :  { %12 = vsyncpa [#allocation8 + $0x1], 0  ;;  %s713_s9 = smov 0   ;;  %s715_s10 = smov 0  }
   0x4   :  { %s717_s11 = smov 0   ;;  %s719_s12 = smov 0  }
   0x5   :  { %s721_s13 = smov 0   ;;  %s723_s14 = smov 0  }
   0x6 LB: > { %s491_s15 = sadd.s32 4294967295, %s694_s14   ;;  %s30_s16 = sadd.s32 1, %s690_s13  ;;  %s694_s14 = sphi %s723_s14, %s18_s14   ;;  %s690_s13 = sphi %s721_s13, %s843_s13   ;;  %s686_s12 = sphi %s719_s12, %s842_s12   ;;  %s682_s11 = sphi %s717_s11, %s841_s11   ;;  %s678_s10 = sphi %s715_s10, %s840_s10   ;;  %s674_s9 = sphi %s713_s9, %s839_s9  }
   0x7   : > { %p32_p0 = scmp.ge.s32.totalorder %s30_s16, 2  ;;  %s39_s17 = sadd.s32 1, %s682_s11 }
   0x8   : > { %p46_p1 = scmp.ne.s32.totalorder %s682_s11, %s678_s10  ;;  %p47_p2 = scmp.eq.s32.totalorder %s694_s14, 0 }
   0x9   : > { %s845_s16 = smov (%p32_p0, %s30_s16), 0  ;;  %p52_p4 = scmp.ne.s32.totalorder %s678_s10, %s674_s9 }
   0xa   : > { %p749_p3 = por %p47_p2, %p46_p1  ;;  %s34_s19 = ssub.s32 %s690_s13, %s845_s16 }
   0xb   : > { %p53_p5 = scmp.eq.s32.totalorder %s491_s15, 0  ;;  %p37_p6 = scmp.eq.s32.totalorder %s34_s19, 0 }
   0xc   : > { %p521_p8 = scmp.lt.s32.totalorder %s694_s14, 2  ;;  %s130_s22 = sand.u32 1, %s682_s11  }
   0xd   : > { %p756_p7 = por %p53_p5, %p52_p4  ;;  %s509_s23 = sshll.u32 %s690_s13, 3 }
   0xe   : > { %s762_s21 = scalar_select %p37_p6, %s682_s11, %s39_s17  }
   0xf   : > { %s495_s24 = sshll.u32 %s130_s22, 3  ;;  %s141_s27 = scalar_lea.hbm %s833_s0, %s509_s23 }
  0x10   : > { %s143_s28 = sshll.u32 %s141_s27, 4  ;;  %s134_s29 = scalar_lea.vmem [#allocation5], %s495_s24  ;;  %s144_s28 = int_to_ptr.hbm [resolvable:$true] %s143_s28 }
  0x11   : > { %s145_s30 = sshll.u32 %s134_s29, 4  ;;  %p771_p9 = pnand %p521_p8, %p749_p3  ;;  %s146_s30 = int_to_ptr.vmem [resolvable:$true] %s145_s30 }
  0x12   : > { %p500_p10 = scmp.ge.s32.totalorder %s694_s14, 1  ;;  %p171_p11 = scmp.lt.s32.totalorder %s694_s14, 3 }
  0x13   : > { %s498_s4 = sshll.u32 %s130_s22, 1  ;;  %s131_s5 = scalar_lea.sflag [#allocation6], %s130_s22 }
  0x14   : > { %517 = dma.hbm_to_vmem [thread:$0]  (!%p771_p9), %s144_s28, 128, %s146_s30, %s131_s5  }
  0x15   : > { %p172_p12 = pnand %p500_p10, %p171_p11  ;;  %s499_s6 = sshll.u32 %s690_s13, 1 }
  0x16   : > { %s156_s7 = scalar_lea.vmem [#allocation7], %s498_s4  ;;  %s162_s17 = scalar_lea.hbm %s834_s1, %s499_s6 }
  0x17   : > { %s166_s8 = sshll.u32 %s156_s7, 4  ;;  %s164_s18 = sshll.u32 %s162_s17, 4  ;;  %s167_s8 = int_to_ptr.vmem [resolvable:$true] %s166_s8  ;;  %s165_s18 = int_to_ptr.hbm [resolvable:$true] %s164_s18 }
  0x18   : > { %s153_s19 = scalar_lea.sflag [#allocation8], %s130_s22  ;;  %175 = sbr.rel (%p172_p12) target bundleno = 240 (0xf0), region = 28 }
  0x19   : > { %520 = dma.hbm_to_vmem [thread:$0]  (!%p771_p9), %s165_s18, 32, %s167_s8, %s153_s19  }
  0x1a   : > { %s177_s23 = sand.u32 (!%p172_p12), 1, %s678_s10  }
  0x1b   : > { %s501_s24 = sshll.u32 (!%p172_p12), %s177_s23, 3  ;;  %s178_s25 = scalar_lea.sflag (!%p172_p12), [#allocation6], %s177_s23 }
  0x1c   : > { %s181_s26 = scalar_lea.vmem (!%p172_p12), [#allocation5], %s501_s24 }
  0x1d   : > { %665 = dma.done.wait (%p756_p7), %s178_s25, 128  }
  0x1e   : > { %667 = vsyncadd (%p756_p7), %s178_s25, 4294967168  ;;  %s502_s27 = sshll.u32 %s177_s23, 1  ;;  %s188_s28 = scalar_lea.sflag [#allocation8], %s177_s23 }
  0x1f   : > { %s790_s29 = scalar_lea.vmem [#allocation7], %s502_s27 }
  0x20   : > { %669 = dma.done.wait (%p756_p7), %s188_s28, 32  }
  0x21   : > { %671 = vsyncadd (%p756_p7), %s188_s28, 4294967264  ;;  %v230_v0 = vld [vmem:[%s181_s26] sm:$0xff]  ;;  %vm253_vm0 = vcmask 1043456   ;;  %v696_v26 = vmov 1   ;;  %vm294_vm1 = vcmask 1040384   ;;  %v300_v36 = vlaneseq  ;;  %p219_p13 = scmp.lt.s32.totalorder %s686_s12, 1 }
  0x22   : > { %246 = vst [vmem:[#allocation1] ss:$2 sm:$0xff] %v230_v0  ;;  %v293_v27 = vrot.slane %v696_v26, 7  ;;  %v231_v31 = vld [vmem:[%s790_s29] sm:$0x3]  ;;  %v697_v45 = vmov 0.0  }
  0x23   : > { %vm292_vm2 = vcmp.ne.s32.totalorder %v231_v31, 4294967295  ;;  %v301_v41 = vshrl.u32 %v300_v36, 7  ;;  %v302_v42 = vperm.slane %v231_v31, 0  ;;  %v303_v43 = vperm.slane %v231_v31, 1  ;;  %s847_s12 = smov (!%p219_p13, %s686_s12), 1 }
  0x24   : > { %v295_v33 = vsel %vm294_vm1, 1, %v293_v27  ;;  %s503_s20 = sshll.u32 %s847_s12, 2  ;;  %vm360_vm7 = vcmask 3072   ;;  %vm374_vm8 = vcmask 11272   ;;  %vm388_vm9 = vcmask 19472  }
  0x25   : > { %vm296_vm3 = vcmp.ne.s32.totalorder %v295_v33, 0  ;;  %vm304_vm5 = vcmp.eq.s32.totalorder %v302_v42, %v301_v41  ;;  %vm305_vm6 = vcmp.eq.s32.totalorder %v303_v43, %v301_v41  ;;  %s222_s3 = scalar_lea.vmem %s835_s2, %s503_s20 }
  0x26   : > { %vm297_vm4 = vmand %vm292_vm2, %vm296_vm3  ;;  %v505_v49 = vsel %vm304_vm5, 1.0, %v697_v45  ;;  %v506_v50 = vsel %vm305_vm6, 1.0, %v697_v45 }
  0x27   : > { %v504_v46 = vsel %vm297_vm4, 1.0, %v697_v45 }
  0x28   : > { %v311_v47 = vperm.slane %v504_v46, 0  ;;  %v312_v48 = vperm.slane %v504_v46, 1 }
  0x29   : > { %v247_v1 = vld.sshfl [vmem:[#allocation1] sm:$0xff pattern:$0x75316420]  ;;  %v248_v2 = vld.sshfl [vmem:[#allocation1 + $0x8] sm:$0xff pattern:$0x75316420] }
  0x2a   : > { %v254_v3 = vsel %vm253_vm0, %v247_v1, -inf  ;;  %v261_v4 = vsel %vm253_vm0, %v248_v2, -inf  ;;  %v315_v55 = vmul.f32 %v505_v49, %v311_v47  ;;  %v316_v56 = vmul.f32 %v506_v50, %v312_v48 }
  0x2b   : > { %v255_v5 = vrot.slane %v254_v3, 4  ;;  %v262_v6 = vrot.slane %v261_v4, 4 }
  0x2d   : > { %v256_v7 = vmax.f32 %v254_v3, %v255_v5  ;;  %v263_v8 = vmax.f32 %v261_v4, %v262_v6  ;;  %v340_v5 = vrot.slane %v316_v56, 4 }
  0x2f   : > { %v257_v9 = vrot.slane %v256_v7, 2  ;;  %v264_v10 = vrot.slane %v263_v8, 2 }
  0x31   : > { %v258_v11 = vmax.f32 %v256_v7, %v257_v9  ;;  %v265_v12 = vmax.f32 %v263_v8, %v264_v10  ;;  %v341_v7 = vsel %vm253_vm0, %v315_v55, %v340_v5 }
  0x33   : > { %v259_v13 = vrot.slane %v258_v11, 1  ;;  %v266_v14 = vrot.slane %v265_v12, 1 }
  0x35   : > { %v260_v15 = vmax.f32 %v258_v11, %v259_v13  ;;  %v267_v16 = vmax.f32 %v265_v12, %v266_v14 }
  0x37   : > { %v268_v17 = vsub.f32 %v247_v1, %v260_v15  ;;  %v269_v18 = vsub.f32 %v248_v2, %v267_v16 }
  0x39   : > { %v270_v19 = vmul.f32 1.442695, %v268_v17  ;;  %v272_v20 = vmul.f32 1.442695, %v269_v18 }
  0x3b   : > { %572 = vpow2.f32 %v270_v19 }
  0x3c   : > { %574 = vpow2.f32 %v272_v20 }
  0x41   : > { %v573_v21 = vpop.eup %572 }
  0x42   : > { %v575_v22 = vpop.eup %574  ;;  %v274_v23 = vsel %vm253_vm0, %v573_v21, 0.0 }
  0x43   : > { %v275_v24 = vrot.slane %v274_v23, 4  ;;  %v281_v25 = vsel %vm253_vm0, %v575_v22, 0.0 }
  0x44   : > { %v282_v28 = vrot.slane %v281_v25, 4 }
  0x45   : > { %v276_v29 = vadd.f32 %v275_v24, %v274_v23 }
  0x46   : > { %v283_v30 = vadd.f32 %v282_v28, %v281_v25 }
  0x47   : > { %v277_v32 = vrot.slane %v276_v29, 2 }
  0x48   : > { %v284_v34 = vrot.slane %v283_v30, 2 }
  0x49   : > { %v278_v35 = vadd.f32 %v277_v32, %v276_v29 }
  0x4a   : > { %v285_v37 = vadd.f32 %v284_v34, %v283_v30 }
  0x4b   : > { %v279_v38 = vrot.slane %v278_v35, 1 }
  0x4c   : > { %v286_v39 = vrot.slane %v285_v37, 1 }
  0x4d   : > { %v280_v40 = vadd.f32 %v279_v38, %v278_v35 }
  0x4e   : > { %v287_v44 = vadd.f32 %v286_v39, %v285_v37 }
  0x4f   : > { %576 = vrcp.f32 %v280_v40 }
  0x50   : > { %578 = vrcp.f32 %v287_v44 }
  0x55   : > { %v577_v51 = vpop.eup %576 }
  0x56   : > { %v579_v52 = vpop.eup %578  ;;  %v290_v53 = vmul.f32 %v577_v51, %v573_v21 }
  0x57   : > { %v291_v54 = vmul.f32 %v579_v52, %v575_v22 }
  0x58   : > { %v317_v57 = vmul.f32 %v311_v47, %v290_v53 }
  0x59   : > { %v318_v58 = vmul.f32 %v312_v48, %v291_v54 }
  0x5a   : > { %v320_v59 = vmul.f32 %v317_v57, %v315_v55 }
  0x5b   : > { %v321_v60 = vmul.f32 %v318_v58, %v316_v56  ;;  %v332_v63 = vrot.slane %v318_v58, 4 }
  0x5d   : > { %v324_v61 = vrot.slane %v321_v60, 4  ;;  %v333_v0 = vsel %vm253_vm0, %v317_v57, %v332_v63 }
  0x5f   : > { %v325_v62 = vsel %vm253_vm0, %v320_v59, %v324_v61 }
  0x60   : > { %350 = vst [vmem:[#allocation1] ss:$2 sm:$0xff] %v325_v62 }
  0x67   : > { %v351_v1 = vld.sshfl [vmem:[#allocation1] sm:$0xff pattern:$0x75316420]  ;;  %v352_v2 = vld.sshfl [vmem:[#allocation1 + $0x8] sm:$0xff pattern:$0x75316420] }
  0x68   : > { %v355_v3 = vsel %vm253_vm0, %v351_v1, 0.0  ;;  %v356_v4 = vsel %vm253_vm0, %v352_v2, 0.0  ;;  %364 = vst [vmem:[#allocation1] ss:$2 sm:$0xff] %v333_v0 }
  0x69   : > { %v357_v6 = vadd.f32 %v356_v4, %v355_v3 }
  0x6b   : > { %358 = vadd.xlane.f32.xlu0 %v357_v6 }
  0x6f   : > { %v365_v8 = vld.sshfl [vmem:[#allocation1] sm:$0xff pattern:$0x75316420]  ;;  %v366_v9 = vld.sshfl [vmem:[#allocation1 + $0x8] sm:$0xff pattern:$0x75316420] }
  0x70   : > { %v369_v10 = vsel %vm253_vm0, %v365_v8, 0.0  ;;  %v370_v11 = vsel %vm253_vm0, %v366_v9, 0.0  ;;  %378 = vst [vmem:[#allocation1] ss:$2 sm:$0xff] %v341_v7 }
  0x71   : > { %v371_v12 = vadd.f32 %v370_v11, %v369_v10 }
  0x73   : > { %372 = vadd.xlane.f32.xlu0 %v371_v12 }
  0x77   : > { %v379_v13 = vld.sshfl [vmem:[#allocation1] sm:$0xff pattern:$0x75316420]  ;;  %v380_v14 = vld.sshfl [vmem:[#allocation1 + $0x8] sm:$0xff pattern:$0x75316420] }
  0x78   : > { %v383_v15 = vsel %vm253_vm0, %v379_v13, 0.0  ;;  %v384_v16 = vsel %vm253_vm0, %v380_v14, 0.0 }
  0x79   : > { %v385_v17 = vadd.f32 %v384_v16, %v383_v15 }
  0x7b   : > { %386 = vadd.xlane.f32.xlu1 %v385_v17 }
  0xde   : > { %v359_v18 = vpop.xlane.xlu0 %358 }
  0xdf   : > { %361 = vst.msk [vmem:[%s222_s3] sm:$0xf] %vm360_vm7, %v359_v18 }
  0xe6   : > { %v373_v19 = vpop.xlane.xlu0 %372 }
  0xe7   : > { %375 = vst.msk [vmem:[%s222_s3] sm:$0xf] %vm374_vm8, %v373_v19 }
  0xee   : > { %v387_v20 = vpop.xlane.xlu1 %386 }
  0xef   : > { %389 = vst.msk [vmem:[%s222_s3] sm:$0xf] %vm388_vm9, %v387_v20 }
  0xf0 PF: > { %s18_s14 = sadd.s32 1, %s694_s14   ;;  %s839_s9 = smov %s678_s10 }
  0xf1   : > { %p15_p0 = scmp.ge.s32.totalorder %s18_s14, 4   ;;  %s840_s10 = smov %s682_s11 }
  0xf2   : > { %s841_s11 = smov %s762_s21  ;;  %s842_s12 = smov %s690_s13 }
  0xf3   : > { %s843_s13 = smov %s845_s16  ;;  %17 = sbr.rel (!%p15_p0) target bundleno = 6 (0x6), region = 89 }
  0xf8   :  { %409 = vsyncpa [#allocation6], 1 }
  0xf9   :  { %411 = vsyncpa [#allocation6 + $0x1], 1 }
  0xfa   :  { %412 = vsyncpa [#allocation8], 1 }
  0xfb   :  { %414 = vsyncpa [#allocation8 + $0x1], 1 }

</bundles_post_ra>
